<compile_context>
chip_gen: v6e
topology: v6e:2x2x1
jax: 0.10.0
libtpu: 0.0.40
codegen_flags: <defaults>
</compile_context>

<pallas_src>
import functools

import jax
import jax.numpy as jnp
from jax.experimental import pallas as pl
from jax.experimental.pallas import tpu as pltpu


def _round_up(x: int, m: int) -> int:
    return ((x + m - 1) // m) * m


# --------------------------------------------------------------------------- kernel
def _logreg_kernel(x_ref, w_ref, b_ref, o_ref):
    # x_ref: (tile_n, ft_in)   w_ref: (ft_in, c_pad)   b_ref: (1, nb_classes) f32
    # o_ref: (tile_n, nb_classes)
    nc = o_ref.shape[-1]
    acc = jnp.dot(x_ref[...], w_ref[...], preferred_element_type=jnp.float32)
    o_ref[...] = (acc[:, :nc] + b_ref[...]).astype(o_ref.dtype)


# ------------------------------------------------------------------- one-time params
def prepare_logreg_params(weight, bias):
    """One-time (model init): W -> (ft_in, c_pad) lane-dense transposed+padded, bias -> f32 (1, nb_classes)."""
    nb_classes, ft_in = weight.shape
    c_pad = _round_up(max(nb_classes, 128), 128)   # keep at 128 lanes; don't over-pad
    w_t = jnp.zeros((ft_in, c_pad), dtype=weight.dtype).at[:, :nb_classes].set(weight.T)
    b2d = bias.astype(jnp.float32).reshape(1, nb_classes)
    return w_t, b2d


def _vmem_budget_bytes() -> int:
    """VMEM we allow ourselves to request: ~75% of physical (leaves compiler headroom)."""
    try:
        cap = int(pltpu.get_tpu_info().vmem_capacity_bytes)
    except Exception:
        cap = 64 * 1024 * 1024          # conservative fallback (v7x-sized)
    return (cap * 3) // 4               # v7x: ~48 MiB, v5e/v6e: ~96 MiB


# --------------------------------------------------------------------------- forward
@functools.partial(jax.jit, static_argnames=("tile_n",))
def _logreg_pallas(seq, w_t, b2d, *, tile_n):
    N, ft_in = seq.shape
    c_pad = w_t.shape[1]
    nb_classes = b2d.shape[1]
    dtype = seq.dtype
    isz = jnp.dtype(dtype).itemsize
    wsz = jnp.dtype(w_t.dtype).itemsize

    grid = (pl.cdiv(N, tile_n),)        # no explicit pad: partial last block is masked on write

    # double-buffered seq & out tiles + resident weight (allow 2 bufs) + bias
    vmem_need = (2 * tile_n * ft_in * isz
                 + 2 * tile_n * c_pad * isz
                 + 2 * ft_in * c_pad * wsz
                 + 8 * 128 * 4)
    budget = _vmem_budget_bytes()
    vmem_limit = min(budget, max(vmem_need + (4 << 20), 32 << 20))
    vmem_limit = int(max(vmem_limit, vmem_need))   # never under-request

    cost = pl.CostEstimate(
        flops=2 * N * ft_in * c_pad,
        transcendentals=0,
        bytes_accessed=isz * (N * ft_in + N * nb_classes) + wsz * ft_in * c_pad,
    )

    return pl.pallas_call(
        _logreg_kernel,
        out_shape=jax.ShapeDtypeStruct((N, nb_classes), dtype),
        grid_spec=pltpu.PrefetchScalarGridSpec(
            num_scalar_prefetch=0,
            grid=grid,
            in_specs=[
                pl.BlockSpec((tile_n, ft_in), lambda i: (i, 0)),   # streamed rows
                pl.BlockSpec((ft_in, c_pad), lambda i: (0, 0)),    # resident weight
                pl.BlockSpec((1, nb_classes), lambda i: (0, 0)),   # resident bias (f32)
            ],
            out_specs=pl.BlockSpec((tile_n, nb_classes), lambda i: (i, 0)),
        ),
        compiler_params=pltpu.CompilerParams(
            dimension_semantics=("parallel",),     # row-parallel -> multi-core sharding
            vmem_limit_bytes=vmem_limit,
        ),
        cost_estimate=cost,
    )(seq, w_t, b2d)


def logreg_forward(seq, w_t, b2d, *, tile_n=None):
    """seq: [N, ft_in]; w_t/b2d from prepare_logreg_params. Returns [N, nb_classes]."""
    N, ft_in = seq.shape
    c_pad = w_t.shape[1]
    isz = jnp.dtype(seq.dtype).itemsize
    wsz = jnp.dtype(w_t.dtype).itemsize

    if tile_n is None:
        # Size the row tile so each grid step moves several MiB (per-step overhead ~0.35us),
        # bounded by the per-chip VMEM budget.
        budget = _vmem_budget_bytes()
        target_tile_bytes = 8 << 20                       # ~8 MiB of seq per step
        per_row = 2 * ft_in * isz + 2 * c_pad * isz       # double-buffered seq + out rows
        fixed = 2 * ft_in * c_pad * wsz + (4 << 20)       # resident weight + slack
        tile_vmem_cap = max((budget - fixed) // per_row, 8)
        tile_target = max(target_tile_bytes // (ft_in * isz), 8)
        tile_n = min(tile_target, tile_vmem_cap, _round_up(N, 8))
        tile_n = max(8, (tile_n // 8) * 8)
    else:
        tile_n = max(8, min(_round_up(tile_n, 8), _round_up(N, 8)))

    return _logreg_pallas(seq, w_t, b2d, tile_n=int(tile_n))


# ------------------------------------------------------------------------------ main
def xavier_uniform(key, shape, dtype=jnp.float32):
    # matches torch.nn.init.xavier_uniform_ for a Linear weight (fan_out, fan_in)
    fan_out, fan_in = shape
    limit = (6.0 / (fan_in + fan_out)) ** 0.5
    return jax.random.uniform(key, shape, dtype, minval=-limit, maxval=limit)


if __name__ == "__main__":
    key = jax.random.PRNGKey(0)
    k_x, k_w = jax.random.split(key)

    N = 500          # not a multiple of the tile -> exercises the masked partial last block
    ft_in = 128      # input feature dim
    nb_classes = 16  # output classes

    seq = jax.random.normal(k_x, (N, ft_in), dtype=jnp.float32)
    weight = xavier_uniform(k_w, (nb_classes, ft_in))    # PyTorch Linear weight layout
    bias = jnp.zeros((nb_classes,), dtype=jnp.float32)   # bias.data.fill_(0.0)

    # one-time parameter prep (model init), outside the per-call hot path
    w_t, b2d = prepare_logreg_params(weight, bias)

    # explicit small tile -> grid=(4,) with a partial last block
    out = logreg_forward(seq, w_t, b2d, tile_n=128)
    out = jax.block_until_ready(out)

    ref = seq @ weight.T + bias
    assert out.shape == (N, nb_classes)
    assert jnp.allclose(out, ref, atol=1e-5, rtol=1e-5)

    # auto tile-size path (single large tile for this small problem)
    out2 = jax.block_until_ready(logreg_forward(seq, w_t, b2d))
    assert jnp.allclose(out2, ref, atol=1e-5, rtol=1e-5)

    print("KERNEL_OK")
</pallas_src>

<mosaic_0001>
module attributes {stable_mosaic.version = 11 : i64} {
  func.func @_logreg_kernel(%arg0: i32, %arg1: memref<128x128xf32, #tpu.memory_space<vmem>>, %arg2: memref<128x128xf32, #tpu.memory_space<vmem>>, %arg3: memref<1x16xf32, #tpu.memory_space<vmem>>, %arg4: memref<128x16xf32, #tpu.memory_space<vmem>>) attributes {dimension_semantics = [#tpu.dimension_semantics<parallel>], iteration_bounds = array<i64: 4>, scalar_prefetch = 0 : i64, scratch_operands = 0 : i64, tpu.core_type = #tpu.core_type<tc>, window_params = [{transform_indices = @transform_0, window_bounds = array<i64: 128, 128>}, {pipeline_mode = #tpu.pipeline_mode<synchronous>, transform_indices = @transform_1, window_bounds = array<i64: 128, 128>}, {pipeline_mode = #tpu.pipeline_mode<synchronous>, transform_indices = @transform_2, window_bounds = array<i64: 1, 16>}, {transform_indices = @transform_3, window_bounds = array<i64: 128, 16>}]} {
    %c0 = arith.constant 0 : index
    %c0_0 = arith.constant 0 : index
    %0 = vector.load %arg1[%c0, %c0_0] : memref<128x128xf32, #tpu.memory_space<vmem>>, vector<128x128xf32>
    %c0_1 = arith.constant 0 : index
    %c0_2 = arith.constant 0 : index
    %1 = vector.load %arg2[%c0_1, %c0_2] : memref<128x128xf32, #tpu.memory_space<vmem>>, vector<128x128xf32>
    %cst = arith.constant dense<0.000000e+00> : vector<128x128xf32>
    %2 = tpu.matmul %0, %1, %cst {dimension_numbers = #tpu.dot_dimension_numbers<[1], [0], [0], [1], [0, 0, 1, 1], [], []>} : vector<128x128xf32>, vector<128x128xf32>, vector<128x128xf32> -> vector<128x128xf32>
    %3 = vector.extract_strided_slice %2 {offsets = [0, 0], sizes = [128, 16], strides = [1, 1]} : vector<128x128xf32> to vector<128x16xf32>
    %c0_3 = arith.constant 0 : index
    %c0_4 = arith.constant 0 : index
    %4 = vector.load %arg3[%c0_3, %c0_4] : memref<1x16xf32, #tpu.memory_space<vmem>>, vector<1x16xf32>
    %5 = vector.broadcast %4 : vector<1x16xf32> to vector<128x16xf32>
    %6 = arith.addf %3, %5 : vector<128x16xf32>
    %c0_5 = arith.constant 0 : index
    %c0_6 = arith.constant 0 : index
    %7 = vector.load %arg4[%c0_5, %c0_6] : memref<128x16xf32, #tpu.memory_space<vmem>>, vector<128x16xf32>
    tpu.vector_store %arg4[%c0_5, %c0_6], %6 {strides = array<i32>} : memref<128x16xf32, #tpu.memory_space<vmem>>, vector<128x16xf32>,
    return
  }
  func.func @transform_0(%arg0: i32) -> (i32, i32) {
    %c0_i32 = arith.constant 0 : i32
    %c0_i32_0 = arith.constant 0 : i32
    return %arg0, %c0_i32 : i32, i32
  }
  func.func @transform_1(%arg0: i32) -> (i32, i32) {
    %c0_i32 = arith.constant 0 : i32
    %c0_i32_0 = arith.constant 0 : i32
    %c0_i32_1 = arith.constant 0 : i32
    return %c0_i32, %c0_i32_0 : i32, i32
  }
  func.func @transform_2(%arg0: i32) -> (i32, i32) {
    %c0_i32 = arith.constant 0 : i32
    %c0_i32_0 = arith.constant 0 : i32
    %c0_i32_1 = arith.constant 0 : i32
    return %c0_i32, %c0_i32_0 : i32, i32
  }
  func.func @transform_3(%arg0: i32) -> (i32, i32) {
    %c0_i32 = arith.constant 0 : i32
    %c0_i32_0 = arith.constant 0 : i32
    return %arg0, %c0_i32 : i32, i32
  }
}

</mosaic_0001>

<bundles_post_ra>
// kernel: _logreg_pallas.1
= control target key start
LH: loop header
LB: loop body
LE: loop exit
PB: predicated region body
PF: predicated region fallthrough
CT: control target
= control target key end

     0   :  { %8 = vsyncpa [#allocation3], 0  ;;  %s1461_s0 = inlined_call_operand.hbm [shape: f32[500,128], index: 0, kind: input, shape index: {}]   ;;  %s1462_s1 = inlined_call_operand.hbm [shape: f32[128,128], index: 1, kind: input, shape index: {}]   ;;  %s1463_s2 = inlined_call_operand.vmem [shape: f32[1,16], index: 2, kind: input, shape index: {}]   ;;  %s1464_s3 = inlined_call_operand.vmem [shape: f32[500,16], index: 3, kind: output, shape index: {}]  }
   0x1   :  { %10 = vsyncpa [#allocation3 + $0x1], 0 }
   0x2   :  { %11 = vsyncpa [#allocation5], 0  ;;  %s1181_s12 = smov 0   ;;  %s1183_s13 = smov 0  }
   0x3   :  { %s1185_s14 = smov 0   ;;  %s1187_s15 = smov 0  }
   0x4 LB: > { %s1200_s16 = sadd.s32 4294967295, %s1121_s15   ;;  %s1203_s17 = sadd.s32 1, %s1121_s15   ;;  %s1121_s15 = sphi %s1187_s15, %s1478_s15   ;;  %s1117_s14 = sphi %s1185_s14, %s1477_s14   ;;  %s1113_s13 = sphi %s1183_s13, %s1476_s13   ;;  %s1109_s12 = sphi %s1181_s12, %s1475_s12  }
   0x5   : > { %s21_s18 = ssub.s32 %s1121_s15, %s1203_s17  ;;  %s24_s19 = sadd.s32 1, %s1117_s14 }
   0x6   : > { %p22_p0 = scmp.eq.s32.totalorder %s21_s18, 0  ;;  %p31_p1 = scmp.ne.s32.totalorder %s1117_s14, %s1113_s13 }
   0x7   : > { %p32_p2 = scmp.eq.s32.totalorder %s1121_s15, 0  ;;  %p37_p3 = scmp.ne.s32.totalorder %s1113_s13, %s1109_s12 }
   0x8   : > { %s1213_s20 = scalar_select %p22_p0, %s1117_s14, %s24_s19  }
   0x9   : > { %p1215_p4 = por %p32_p2, %p31_p1  ;;  %p38_p5 = scmp.eq.s32.totalorder %s1200_s16, 0 }
   0xa   : > { %p103_p6 = scmp.eq.s32.totalorder %s1200_s16, 3  ;;  %p731_p7 = scmp.ge.s32.totalorder %s1121_s15, 1 }
   0xb   : > { %p1224_p8 = por %p38_p5, %p37_p3  ;;  %p116_p9 = scmp.lt.s32.totalorder %s1121_s15, 5 }
   0xc   : > { %p1229_p10 = por %p103_p6, %p31_p1  ;;  %s1155_s25 = smov [#allocation4]  }
   0xd   : > { %s1467_s22 = scalar_select %p1224_p8, 1, 0 }
   0xe   : > { %s1468_s23 = scalar_select %p1229_p10, 1, 0 }
   0xf   : > { %p1233_p11 = pnand %p731_p7, %p116_p9  ;;  %s128_s26 = sshll.u32 %s1155_s25, 4  ;;  %s129_s26 = int_to_ptr.vmem [resolvable:$true] %s128_s26 }
  0x10   : > { %s1010_s27 = scalar_lea.vmem %s129_s26, 2048  ;;  %p1018_p6 = scmp.lt.s32.totalorder %s129_s26, %s129_s26 }
  0x11   : > { %p892_p12 = pneg %p1233_p11  ;;  %p1011_p2 = scmp.ne.s32.totalorder %s129_s26, %s1010_s27 }
  0x12   : > { %p1019_p8 = scmp.lt.s32.totalorder %s1010_s27, %s1010_s27 }
  0x13   : > { %p893_p13 = pnand %p892_p12, %p38_p5 }
  0x14   : > { %p1020_p10 = por %p1019_p8, %p1018_p6 }
  0x15   : > { %p1001_p0 = pneg %p893_p13 }
  0x17   : > { %p1013_p3 = pnand %p1011_p2, %p1001_p0 }
  0x19   : > { %p1014_p1 = pneg %p1013_p3 }
  0x1b   : > { %p1021_p7 = pnand %p1020_p10, %p1014_p1 }
  0x1d   : > { %1024 = shalt.err (!%p1021_p7)
}
  0x1e   : > { %s1156_s28 = smov 128   ;;  %s1157_s29 = smov 8  }
  0x1f   : > { %895 = dma.hbm_to_vmem [thread:$0]  (!%p893_p13), %s1462_s1, 2048, %s129_s26, [#allocation5], %s1156_s28, %s1156_s28, %s1157_s29  }
  0x20   : > { %p733_p9 = scmp.ge.s32.totalorder %s1121_s15, 4 }
  0x22   : > { %141 = sbr.rel (%p733_p9) target bundleno = 71 (0x47), region = 24 }
  0x27   : > { %144 = sbr.rel (!%p1215_p4) target bundleno = 71 (0x47), region = 28  ;;  %s145_s5 = sand.u32 (%p1215_p4), 1, %s1117_s14  }
  0x28   : > { %s735_s6 = sshll.u32 (%p1215_p4), %s1121_s15, 4  ;;  %s734_s7 = sshll.u32 (%p1215_p4), %s145_s5, 7 }
  0x29   : > { %s151_s8 = ssub.s32 (%p1215_p4), 63, %s735_s6  ;;  %s1252_s11 = scalar_lea.sflag (%p1215_p4), [#allocation3], %s145_s5 }
  0x2a   : > { %p152_p8 = scmp.lt.s32.totalorder (%p1215_p4), %s151_s8, 16  ;;  %s149_s12 = scalar_lea.vmem (%p1215_p4), [#allocation2], %s734_s7 }
  0x2c   : > { %s1480_s8 = smov (!%p152_p8, %s151_s8), 16 }
  0x2d   : > { %s1249_s9 = sshll.u32 %s1480_s8, 7 }
  0x2e   : > { %s156_s10 = ssub.s32 2048, %s1249_s9 }
  0x2f   : > { %157 = vsyncadd %s1252_s11, %s156_s10  ;;  %p737_p4 = scmp.ne.s32.totalorder %s1249_s9, 0  ;;  %s763_s18 = sshll.u32 %s1121_s15, 11 }
  0x30   : > { %s1260_s25 = scalar_lea.hbm %s1461_s0, %s763_s18  ;;  %s162_s26 = sshll.u32 %s149_s12, 4  ;;  %s1262_s26 = int_to_ptr.vmem [resolvable:$true] %s162_s26 }
  0x31   : > { %s1025_s27 = scalar_lea.hbm %s1260_s25, %s1249_s9  ;;  %s1029_s15 = scalar_lea.hbm %s1461_s0, 8064 }
  0x32   : > { %p1026_p10 = scmp.ne.s32.totalorder %s1260_s25, %s1025_s27  ;;  %p1030_p0 = scmp.lt.s32.totalorder %s1260_s25, %s1461_s0 }
  0x33   : > { %p1031_p2 = scmp.lt.s32.totalorder %s1029_s15, %s1025_s27 }
  0x34   : > { %p1027_p12 = pnand %p1026_p10, %p737_p4 }
  0x35   : > { %p1032_p3 = por %p1031_p2, %p1030_p0 }
  0x36   : > { %p1028_p13 = pneg %p1027_p12 }
  0x38   : > { %p1033_p1 = pnand %p1032_p3, %p1028_p13 }
  0x3a   : > { %1036 = shalt.err (!%p1033_p1)
}
  0x3b   : > { %s1037_s5 = scalar_lea.vmem %s1262_s26, %s1249_s9  ;;  %s1158_s6 = smov [#allocation2]  }
  0x3c   : > { %p1038_p6 = scmp.ne.s32.totalorder %s1262_s26, %s1037_s5  ;;  %s1041_s7 = sshll.u32 %s1158_s6, 4  ;;  %s1042_s7 = int_to_ptr.vmem [resolvable:$false] %s1041_s7 }
  0x3d   : > { %s1043_s8 = scalar_lea.vmem %s1042_s7, 4096  ;;  %p1044_p8 = scmp.lt.s32.totalorder %s1262_s26, %s1042_s7 }
  0x3e   : > { %p1039_p7 = pnand %p1038_p6, %p737_p4  ;;  %p1045_p10 = scmp.lt.s32.totalorder %s1043_s8, %s1037_s5 }
  0x40   : > { %p1040_p9 = pneg %p1039_p7  ;;  %p1046_p12 = por %p1045_p10, %p1044_p8 }
  0x42   : > { %p1047_p0 = pnand %p1046_p12, %p1040_p9 }
  0x44   : > { %1050 = shalt.err (!%p1047_p0)
}
  0x45   : > { %s1159_s10 = smov 128   ;;  %s1160_s12 = smov 8  }
  0x46   : > { %168 = dma.hbm_to_vmem [thread:$0]  (%p737_p4), %s1260_s25, %s1249_s9, %s1262_s26, %s1252_s11, %s1159_s10, %s1159_s10, %s1160_s12  }
  0x47 PF: > { %174 = sbr.rel (%p1233_p11) target bundleno = 364 (0x16c), region = 32  ;;  %s176_s18 = sand.u32 (!%p1233_p11), 1, %s1113_s13  }
  0x48   : > { %s1291_s19 = sshll.u32 (!%p1233_p11), %s176_s18, 7  ;;  %s177_s21 = scalar_lea.sflag (!%p1233_p11), [#allocation3], %s176_s18 }
  0x49   : > { %s1294_s27 = scalar_lea.vmem (!%p1233_p11), [#allocation2], %s1291_s19  ;;  %p1470_p13 = scmp.ne.s32.totalorder (!%p1233_p11), %s1467_s22, 0 }
  0x4c   : > { %1100 = dma.done.wait (%p1470_p13), %s177_s21, 2048  }
  0x4d   : > { %1102 = vsyncadd (%p1470_p13), %s177_s21, 4294965248 }
  0x4e   : > { %1104 = dma.done.wait (%p38_p5), [#allocation5], 2048  }
  0x4f   : > { %1106 = vsyncadd (%p38_p5), [#allocation5], 4294965248  ;;  %v247_v0 = vld [vmem:[#allocation4 + $0x78] sm:$0xff]  ;;  %v246_v1 = vld [vmem:[#allocation4 + $0x70] sm:$0xff]  ;;  %vm416_vm0 = vcmask 130048   ;;  %s1324_s9 = scalar_lea.vmem [#allocation6], %s1291_s19  }
  0x50   : > { %799 = vmatprep.subr.mxu0 %v247_v0  ;;  %855 = vmatprep.subr.mxu1 %v247_v0  ;;  %v245_v2 = vld [vmem:[#allocation4 + $0x68] sm:$0xff]  ;;  %v244_v3 = vld [vmem:[#allocation4 + $0x60] sm:$0xff]  ;;  %v243_v4 = vld [vmem:[#allocation4 + $0x58] sm:$0xff]  ;;  %p1471_p5 = scmp.ne.s32.totalorder %s1468_s23, 0 }
  0x51   : > { %800 = vmatpush3.msra.mxu0 %v247_v0  ;;  %871 = vmatpush3.msra.mxu1 %v247_v0  ;;  %v242_v5 = vld [vmem:[#allocation4 + $0x50] sm:$0xff]  ;;  %v241_v6 = vld [vmem:[#allocation4 + $0x48] sm:$0xff]  ;;  %v240_v7 = vld [vmem:[#allocation4 + $0x40] sm:$0xff]  ;;  %s747_s11 = sshll.u32 (%p1471_p5), %s1200_s16, 4  ;;  %s764_s25 = sshll.u32 (%p1471_p5), %s1200_s16, 7 }
  0x52   : > { %801 = vmatprep.subr.mxu0 %v246_v1  ;;  %856 = vmatprep.subr.mxu1 %v246_v1  ;;  %v239_v8 = vld [vmem:[#allocation4 + $0x38] sm:$0xff]  ;;  %v238_v9 = vld [vmem:[#allocation4 + $0x30] sm:$0xff]  ;;  %v237_v10 = vld [vmem:[#allocation4 + $0x28] sm:$0xff]  ;;  %s441_s26 = ssub.s32 (%p1471_p5), 63, %s747_s11  ;;  %s1365_s15 = scalar_lea.vmem (%p1471_p5), %s1464_s3, %s764_s25  }
  0x53   : > { %802 = vmatpush3.msra.mxu0 %v246_v1  ;;  %872 = vmatpush3.msra.mxu1 %v246_v1  ;;  %v236_v11 = vld [vmem:[#allocation4 + $0x20] sm:$0xff]  ;;  %v235_v12 = vld [vmem:[#allocation4 + $0x18] sm:$0xff]  ;;  %v234_v13 = vld [vmem:[#allocation4 + $0x10] sm:$0xff]  ;;  %p442_p11 = scmp.lt.s32.totalorder (%p1471_p5), %s441_s26, 16 }
  0x54   : > { %803 = vmatprep.subr.mxu0 %v245_v2  ;;  %857 = vmatprep.subr.mxu1 %v245_v2  ;;  %v233_v14 = vld [vmem:[#allocation4 + $0x8] sm:$0xff]  ;;  %v232_v15 = vld [vmem:[#allocation4] sm:$0xff]  ;;  %v218_v20 = vld [vmem:[%s1294_s27 + $0x10] sm:$0xff] }
  0x55   : > { %804 = vmatpush3.msra.mxu0 %v245_v2  ;;  %873 = vmatpush3.msra.mxu1 %v245_v2  ;;  %v216_v16 = vld [vmem:[%s1294_s27] sm:$0xff]  ;;  %v217_v18 = vld [vmem:[%s1294_s27 + $0x8] sm:$0xff]  ;;  %v226_v21 = vld [vmem:[%s1294_s27 + $0x50] sm:$0xff] }
  0x56   : > { %805 = vmatprep.subr.mxu0 %v244_v3  ;;  %858 = vmatprep.subr.mxu1 %v244_v3  ;;  %v224_v17 = vld [vmem:[%s1294_s27 + $0x40] sm:$0xff]  ;;  %v225_v19 = vld [vmem:[%s1294_s27 + $0x48] sm:$0xff]  ;;  %v219_v22 = vld [vmem:[%s1294_s27 + $0x18] sm:$0xff] }
  0x57   : > { %806 = vmatpush3.msra.mxu0 %v244_v3  ;;  %874 = vmatpush3.msra.mxu1 %v244_v3  ;;  %v227_v23 = vld [vmem:[%s1294_s27 + $0x58] sm:$0xff]  ;;  %v220_v24 = vld [vmem:[%s1294_s27 + $0x20] sm:$0xff]  ;;  %v221_v26 = vld [vmem:[%s1294_s27 + $0x28] sm:$0xff] }
  0x58   : > { %807 = vmatprep.subr.mxu0 %v243_v4  ;;  %859 = vmatprep.subr.mxu1 %v243_v4  ;;  %v228_v25 = vld [vmem:[%s1294_s27 + $0x60] sm:$0xff]  ;;  %v229_v27 = vld [vmem:[%s1294_s27 + $0x68] sm:$0xff]  ;;  %v222_v28 = vld [vmem:[%s1294_s27 + $0x30] sm:$0xff] }
  0x59   : > { %808 = vmatpush3.msra.mxu0 %v243_v4  ;;  %875 = vmatpush3.msra.mxu1 %v243_v4  ;;  %v230_v29 = vld [vmem:[%s1294_s27 + $0x70] sm:$0xff]  ;;  %v223_v30 = vld [vmem:[%s1294_s27 + $0x38] sm:$0xff]  ;;  %v745_v32 = vld [vmem:[%s1463_s2] ss:$0 sm:$0xff] }
  0x5a   : > { %809 = vmatprep.subr.mxu0 %v242_v5  ;;  %860 = vmatprep.subr.mxu1 %v242_v5  ;;  %v231_v31 = vld [vmem:[%s1294_s27 + $0x78] sm:$0xff] }
  0x5b   : > { %810 = vmatpush3.msra.mxu0 %v242_v5  ;;  %876 = vmatpush3.msra.mxu1 %v242_v5 }
  0x5c   : > { %811 = vmatprep.subr.mxu0 %v241_v6  ;;  %861 = vmatprep.subr.mxu1 %v241_v6 }
  0x5d   : > { %812 = vmatpush3.msra.mxu0 %v241_v6  ;;  %877 = vmatpush3.msra.mxu1 %v241_v6 }
  0x5e   : > { %813 = vmatprep.subr.mxu0 %v240_v7  ;;  %862 = vmatprep.subr.mxu1 %v240_v7 }
  0x5f   : > { %814 = vmatpush3.msra.mxu0 %v240_v7  ;;  %878 = vmatpush3.msra.mxu1 %v240_v7 }
  0x60   : > { %815 = vmatprep.subr.mxu0 %v239_v8  ;;  %863 = vmatprep.subr.mxu1 %v239_v8 }
  0x61   : > { %816 = vmatpush3.msra.mxu0 %v239_v8  ;;  %879 = vmatpush3.msra.mxu1 %v239_v8 }
  0x62   : > { %817 = vmatprep.subr.mxu0 %v238_v9  ;;  %864 = vmatprep.subr.mxu1 %v238_v9 }
  0x63   : > { %818 = vmatpush3.msra.mxu0 %v238_v9  ;;  %880 = vmatpush3.msra.mxu1 %v238_v9 }
  0x64   : > { %819 = vmatprep.subr.mxu0 %v237_v10  ;;  %865 = vmatprep.subr.mxu1 %v237_v10 }
  0x65   : > { %820 = vmatpush3.msra.mxu0 %v237_v10  ;;  %881 = vmatpush3.msra.mxu1 %v237_v10 }
  0x66   : > { %821 = vmatprep.subr.mxu0 %v236_v11  ;;  %866 = vmatprep.subr.mxu1 %v236_v11 }
  0x67   : > { %822 = vmatpush3.msra.mxu0 %v236_v11  ;;  %882 = vmatpush3.msra.mxu1 %v236_v11 }
  0x68   : > { %823 = vmatprep.subr.mxu0 %v235_v12  ;;  %867 = vmatprep.subr.mxu1 %v235_v12 }
  0x69   : > { %824 = vmatpush3.msra.mxu0 %v235_v12  ;;  %883 = vmatpush3.msra.mxu1 %v235_v12 }
  0x6a   : > { %825 = vmatprep.subr.mxu0 %v234_v13  ;;  %868 = vmatprep.subr.mxu1 %v234_v13 }
  0x6b   : > { %826 = vmatpush3.msra.mxu0 %v234_v13  ;;  %884 = vmatpush3.msra.mxu1 %v234_v13 }
  0x6c   : > { %827 = vmatprep.subr.mxu0 %v233_v14  ;;  %869 = vmatprep.subr.mxu1 %v233_v14 }
  0x6d   : > { %828 = vmatpush3.msra.mxu0 %v233_v14  ;;  %885 = vmatpush3.msra.mxu1 %v233_v14 }
  0x6e   : > { %829 = vmatprep.subr.mxu0 %v232_v15  ;;  %870 = vmatprep.subr.mxu1 %v232_v15 }
  0x6f   : > { %830 = vmatpush3.msra.mxu0 %v232_v15  ;;  %886 = vmatpush3.msra.mxu1 %v232_v15 }
  0x70   : > { %831 = vmatprep.mubr.f32.mxu0 %v216_v16  ;;  %843 = vmatprep.mubr.f32.mxu1 %v224_v17 }
  0x71   : > { %832 = vmatmul.mubr.f32.vlgmr.msra.gmra.mxu0 %v217_v18  ;;  %844 = vmatmul.mubr.f32.vlgmr.msra.gmra.mxu1 %v225_v19 }
  0x72   : > { %834 = vmatprep.mubr.f32.mxu0 %v218_v20  ;;  %846 = vmatprep.mubr.f32.mxu1 %v226_v21 }
  0x75   : > { %835 = vmatmul.mubr.f32.gmra.mxu0 %v219_v22  ;;  %847 = vmatmul.mubr.f32.gmra.mxu1 %v227_v23 }
  0x76   : > { %837 = vmatprep.mubr.f32.mxu0 %v220_v24  ;;  %849 = vmatprep.mubr.f32.mxu1 %v228_v25 }
  0x79   : > { %838 = vmatmul.mubr.f32.gmra.mxu0 %v221_v26  ;;  %850 = vmatmul.mubr.f32.gmra.mxu1 %v229_v27 }
  0x7a   : > { %840 = vmatprep.mubr.f32.mxu0 %v222_v28  ;;  %852 = vmatprep.mubr.f32.mxu1 %v230_v29 }
  0x7d   : > { %841 = vmatmul.mubr.f32.gmra.mxu0 %v223_v30  ;;  %853 = vmatmul.mubr.f32.gmra.mxu1 %v231_v31 }
 0x131   : > { %v833_v33 = vpop.f32.mrf.mxu0  ;;  %v845_v34 = vpop.f32.mrf.mxu1 }
 0x132   : > { %v401_v35 = vadd.f32 %v833_v33, %v745_v32  ;;  %v409_v36 = vadd.f32 %v845_v34, %v745_v32 }
 0x133   : > { %v314_v37 = vpop.f32.mrf.mxu0  ;;  %v354_v38 = vpop.f32.mrf.mxu1 }
 0x134   : > { %418 = vst.msk [vmem:[%s1324_s9 + $0x8] sm:$0xff] %vm416_vm0, %v401_v35  ;;  %426 = vst.msk [vmem:[%s1324_s9 + $0x48] sm:$0xff] %vm416_vm0, %v409_v36  ;;  %v400_v39 = vadd.f32 %v745_v32, %v314_v37  ;;  %v408_v40 = vadd.f32 %v745_v32, %v354_v38 }
 0x135   : > { %v836_v41 = vpop.f32.mrf.mxu0  ;;  %v848_v42 = vpop.f32.mrf.mxu1 }
 0x136   : > { %417 = vst.msk [vmem:[%s1324_s9] sm:$0xff] %vm416_vm0, %v400_v39  ;;  %425 = vst.msk [vmem:[%s1324_s9 + $0x40] sm:$0xff] %vm416_vm0, %v408_v40  ;;  %v403_v43 = vadd.f32 %v836_v41, %v745_v32  ;;  %v411_v44 = vadd.f32 %v848_v42, %v745_v32 }
 0x137   : > { %v324_v45 = vpop.f32.mrf.mxu0  ;;  %v364_v46 = vpop.f32.mrf.mxu1 }
 0x138   : > { %420 = vst.msk [vmem:[%s1324_s9 + $0x18] sm:$0xff] %vm416_vm0, %v403_v43  ;;  %428 = vst.msk [vmem:[%s1324_s9 + $0x58] sm:$0xff] %vm416_vm0, %v411_v44  ;;  %v402_v47 = vadd.f32 %v745_v32, %v324_v45  ;;  %v410_v48 = vadd.f32 %v745_v32, %v364_v46 }
 0x139   : > { %v839_v49 = vpop.f32.mrf.mxu0  ;;  %v851_v50 = vpop.f32.mrf.mxu1 }
 0x13a   : > { %419 = vst.msk [vmem:[%s1324_s9 + $0x10] sm:$0xff] %vm416_vm0, %v402_v47  ;;  %427 = vst.msk [vmem:[%s1324_s9 + $0x50] sm:$0xff] %vm416_vm0, %v410_v48  ;;  %v405_v51 = vadd.f32 %v839_v49, %v745_v32  ;;  %v413_v52 = vadd.f32 %v851_v50, %v745_v32 }
 0x13b   : > { %v334_v53 = vpop.f32.mrf.mxu0  ;;  %v374_v54 = vpop.f32.mrf.mxu1 }
 0x13c   : > { %422 = vst.msk [vmem:[%s1324_s9 + $0x28] sm:$0xff] %vm416_vm0, %v405_v51  ;;  %430 = vst.msk [vmem:[%s1324_s9 + $0x68] sm:$0xff] %vm416_vm0, %v413_v52  ;;  %v404_v55 = vadd.f32 %v745_v32, %v334_v53  ;;  %v412_v56 = vadd.f32 %v745_v32, %v374_v54 }
 0x13d   : > { %v842_v57 = vpop.f32.mrf.mxu0  ;;  %v854_v58 = vpop.f32.mrf.mxu1 }
 0x13e   : > { %421 = vst.msk [vmem:[%s1324_s9 + $0x20] sm:$0xff] %vm416_vm0, %v404_v55  ;;  %429 = vst.msk [vmem:[%s1324_s9 + $0x60] sm:$0xff] %vm416_vm0, %v412_v56  ;;  %v407_v59 = vadd.f32 %v842_v57, %v745_v32  ;;  %v415_v60 = vadd.f32 %v854_v58, %v745_v32  ;;  %439 = sbr.rel (!%p1471_p5) target bundleno = 364 (0x16c), region = 44 }
 0x13f   : > { %v344_v61 = vpop.f32.mrf.mxu0  ;;  %v384_v62 = vpop.f32.mrf.mxu1 }
 0x140   : > { %424 = vst.msk [vmem:[%s1324_s9 + $0x38] sm:$0xff] %vm416_vm0, %v407_v59  ;;  %432 = vst.msk [vmem:[%s1324_s9 + $0x78] sm:$0xff] %vm416_vm0, %v415_v60  ;;  %v406_v63 = vadd.f32 %v745_v32, %v344_v61  ;;  %v414_v0 = vadd.f32 %v745_v32, %v384_v62 }
 0x142   : > { %423 = vst.msk [vmem:[%s1324_s9 + $0x30] sm:$0xff] %vm416_vm0, %v406_v63  ;;  %431 = vst.msk [vmem:[%s1324_s9 + $0x70] sm:$0xff] %vm416_vm0, %v414_v0 }
 0x143   : > { %s1482_s26 = smov (!%p442_p11, %s441_s26), 16 }
 0x144   : > { %s748_s30 = sshll.u32 %s1482_s26, 7 }
 0x145   : > { %p751_p4 = scmp.eq.s32.totalorder %s748_s30, 0 }
 0x146   : > { %s1371_s23 = sshrl.u32 (!%p751_p4), %s1482_s26, 4 }
 0x147   : > { %450 = sbr.rel (%p751_p4) target bundleno = 364 (0x16c), region = 48  ;;  %p752_p2 = scmp.le.s32.totalorder (!%p751_p4), %s1371_s23, 0 }
 0x14c   : > { %674 = sbr.rel (%p752_p2) target bundleno = 347 (0x15b), region = 130  ;;  %s1472_s16 = smov (!%p752_p2), %s1365_s15 }
 0x14d   : > { %s1473_s4 = smov (!%p752_p2), %s1324_s9  ;;  %s1380_s5 = smov (!%p752_p2), 0  }
 0x14e   : > { %s1382_s6 = smov (!%p752_p2), 0  }
 0x151 LB: >> { %v543_v1 = vld [vmem:[%s1129_s4] sm:$0xff]  ;;  %v545_v2 = vld [vmem:[%s1129_s4 + $0x8] sm:$0xff]  ;;  %v547_v3 = vld [vmem:[%s1129_s4 + $0x10] sm:$0xff]  ;;  %s575_s7 = sadd.s32 1, %s1133_s5  ;;  %s537_s6 = sadd.s32 1, %s1137_s6   ;;  %s1137_s6 = sphi %s1382_s6, %s537_s6   ;;  %s1133_s5 = sphi %s1380_s5, %s1474_s5   ;;  %s1129_s4 = sphi %s1473_s4, %s580_s4   ;;  %s1125_s16 = sphi %s1472_s16, %s581_s16  }
 0x152   : >> { %544 = vst [vmem:[%s1125_s16] sm:$0xff] %v543_v1  ;;  %546 = vst [vmem:[%s1125_s16 + $0x8] sm:$0xff] %v545_v2  ;;  %v549_v4 = vld [vmem:[%s1129_s4 + $0x18] sm:$0xff]  ;;  %v551_v5 = vld [vmem:[%s1129_s4 + $0x20] sm:$0xff]  ;;  %p576_p3 = scmp.ge.s32.totalorder %s575_s7, %s1371_s23  ;;  %p536_p1 = scmp.ge.s32.totalorder %s537_s6, %s1371_s23 }
 0x153   : >> { %548 = vst [vmem:[%s1125_s16 + $0x10] sm:$0xff] %v547_v3  ;;  %v553_v6 = vld [vmem:[%s1129_s4 + $0x28] sm:$0xff]  ;;  %550 = vst [vmem:[%s1125_s16 + $0x18] sm:$0xff] %v549_v4  ;;  %v555_v7 = vld [vmem:[%s1129_s4 + $0x30] sm:$0xff] }
 0x154   : >> { %552 = vst [vmem:[%s1125_s16 + $0x20] sm:$0xff] %v551_v5  ;;  %554 = vst [vmem:[%s1125_s16 + $0x28] sm:$0xff] %v553_v6  ;;  %v557_v8 = vld [vmem:[%s1129_s4 + $0x38] sm:$0xff]  ;;  %v559_v9 = vld [vmem:[%s1129_s4 + $0x40] sm:$0xff]  ;;  %s1484_s7 = smov (%p576_p3, %s575_s7), 0 }
 0x155   : >> { %556 = vst [vmem:[%s1125_s16 + $0x30] sm:$0xff] %v555_v7  ;;  %558 = vst [vmem:[%s1125_s16 + $0x38] sm:$0xff] %v557_v8  ;;  %v561_v10 = vld [vmem:[%s1129_s4 + $0x48] sm:$0xff]  ;;  %v563_v11 = vld [vmem:[%s1129_s4 + $0x50] sm:$0xff]  ;;  %s753_s8 = sshll.u32 %s1484_s7, 7  ;;  %s1474_s5 = smov %s1484_s7 }
 0x156   : >> { %560 = vst [vmem:[%s1125_s16 + $0x40] sm:$0xff] %v559_v9  ;;  %v565_v12 = vld [vmem:[%s1129_s4 + $0x58] sm:$0xff]  ;;  %562 = vst [vmem:[%s1125_s16 + $0x48] sm:$0xff] %v561_v10  ;;  %v567_v13 = vld [vmem:[%s1129_s4 + $0x60] sm:$0xff]  ;;  %539 = sbr.rel (!%p536_p1) target bundleno = 337 (0x151), region = 136 }
 0x157   : >> { %564 = vst [vmem:[%s1125_s16 + $0x50] sm:$0xff] %v563_v11  ;;  %566 = vst [vmem:[%s1125_s16 + $0x58] sm:$0xff] %v565_v12  ;;  %v569_v14 = vld [vmem:[%s1129_s4 + $0x68] sm:$0xff]  ;;  %v571_v15 = vld [vmem:[%s1129_s4 + $0x70] sm:$0xff] }
 0x158   : >> { %568 = vst [vmem:[%s1125_s16 + $0x60] sm:$0xff] %v567_v13  ;;  %570 = vst [vmem:[%s1125_s16 + $0x68] sm:$0xff] %v569_v14  ;;  %v573_v16 = vld [vmem:[%s1129_s4 + $0x78] sm:$0xff]  ;;  %s580_s4 = scalar_lea.vmem %s1324_s9, %s753_s8 [#allocation6]  }
 0x159   : >> { %572 = vst [vmem:[%s1125_s16 + $0x70] sm:$0xff] %v571_v15  ;;  %574 = vst [vmem:[%s1125_s16 + $0x78] sm:$0xff] %v573_v16  ;;  %s581_s16 = scalar_lea.vmem %s1365_s15, %s753_s8  }
 0x15b PF: > { %s1440_s10 = sand.u32 15, %s1482_s26   ;;  %s765_s12 = sshll.u32 %s1371_s23, 7 }
 0x15c   : > { %s586_s18 = scalar_lea.vmem %s1324_s9, %s765_s12 [#allocation6]   ;;  %s588_s19 = scalar_lea.vmem %s1365_s15, %s765_s12  }
 0x15d   : > { %p758_p6 = scmp.le.s32.totalorder %s1440_s10, 0 }
 0x15e   : > { %s1139_s21 = smov (!%p758_p6), %s588_s19   ;;  %s1143_s27 = smov (!%p758_p6), %s586_s18  }
 0x15f   : > { %688 = sbr.rel (%p758_p6) target bundleno = 364 (0x16c), region = 141  ;;  %s1147_s22 = smov (!%p758_p6), 0  }
 0x160   : > { %s1151_s24 = smov (!%p758_p6), 0  }
 0x164 LB: >> { %v598_v17 = vld [vmem:[%s1145_s27] sm:$0xff]  ;;  %s600_s11 = sadd.s32 1, %s1149_s22  ;;  %s592_s24 = sadd.s32 1, %s1153_s24   ;;  %s1153_s24 = sphi %s1151_s24, %s592_s24   ;;  %s1149_s22 = sphi %s1147_s22, %s1148_s22   ;;  %s1145_s27 = sphi %s1143_s27, %s605_s27   ;;  %s1141_s21 = sphi %s1139_s21, %s606_s21  }
 0x165   : >> { %599 = vst [vmem:[%s1141_s21] sm:$0xff] %v598_v17  ;;  %p601_p7 = scmp.ge.s32.totalorder %s600_s11, %s1440_s10  ;;  %p591_p9 = scmp.ge.s32.totalorder %s592_s24, %s1440_s10 }
 0x167   : >> { %s1486_s11 = smov (%p601_p7, %s600_s11), 0  ;;  %594 = sbr.rel (!%p591_p9) target bundleno = 356 (0x164), region = 147 }
 0x168   : >> { %s759_s9 = sshll.u32 %s1486_s11, 3  ;;  %s1148_s22 = smov %s1486_s11  }
 0x169   : >> { %s605_s27 = scalar_lea.vmem %s586_s18, %s759_s9 [#allocation6]   ;;  %s606_s21 = scalar_lea.vmem %s588_s19, %s759_s9  }
 0x16c PF: > { %p14_p8 = scmp.ge.s32.totalorder %s1203_s17, 6   ;;  %s1475_s12 = smov %s1113_s13 }
 0x16d   : > { %s1476_s13 = smov %s1117_s14  ;;  %s1477_s14 = smov %s1213_s20 }
 0x16e   : > { %s1478_s15 = smov %s1203_s17  ;;  %16 = sbr.rel (!%p14_p8) target bundleno = 4 (0x4), region = 158 }
 0x173   :  { %622 = vsyncpa [#allocation3], 1 }
 0x174   :  { %624 = vsyncpa [#allocation3 + $0x1], 1 }
 0x175   :  { %625 = vsyncpa [#allocation5], 1 }

</bundles_post_ra>
